<compile_context>
chip_gen: v7x
topology: tpu7x:2x2x1
jax: 0.10.0
libtpu: 0.0.40
codegen_flags: <defaults>
</compile_context>

<pallas_src>
import jax
import jax.numpy as jnp
from jax import lax
from jax.experimental import pallas as pl
from jax.experimental.pallas import tpu as pltpu


def attn_slot_kernel(hidden_ref, outputs_ref, mask_ref, ctx_ref):
    h = hidden_ref[...]                      # (bB, S, Hp)  input dtype
    o = outputs_ref[...]                     # (bB, L, Hp)  input dtype
    m = mask_ref[...]                        # (bB, S, L)   int8, nonzero = masked

    # attention energies: batched NT contraction on the last (lane) dim  (MXU)
    #   (bB,S,Hp) x (bB,L,Hp) -> (bB,S,L)
    scores = lax.dot_general(
        h, o,
        dimension_numbers=(((2,), (2,)), ((0,), (0,))),
        preferred_element_type=jnp.float32,
    )
    scores = jnp.where(m != 0, jnp.float32(-1e12), scores)

    # softmax numerator in f32 (VPU/EUP); normalization deferred past the
    # context matmul so we scale S*H values instead of dividing S*L.
    mx = jnp.max(scores, axis=-1, keepdims=True)
    p = jnp.exp(scores - mx)                             # (bB, S, L) f32
    denom = jnp.sum(p, axis=-1, keepdims=True)           # (bB, S, 1) f32

    # unnormalized context: (bB,S,L) x (bB,L,Hp) -> (bB,S,Hp)   (MXU)
    ctx_un = lax.dot_general(
        p.astype(o.dtype), o,
        dimension_numbers=(((2,), (1,)), ((0,), (0,))),
        preferred_element_type=jnp.float32,
    )
    inv = pl.reciprocal(denom, approx=True)              # EUP
    ctx_ref[...] = (ctx_un * inv).astype(ctx_ref.dtype)


def _pad_axis(x, axis, mult):
    pad = (-x.shape[axis]) % mult
    if pad == 0:
        return x
    widths = [(0, 0)] * x.ndim
    widths[axis] = (0, pad)
    return jnp.pad(x, widths)


def _pick_batch_block(B, target=8):
    """Largest divisor of B <= target, keeping >= 2 grid steps when B >= 2
    so both v7x TensorCores get work."""
    cap = min(target, B if B < 2 else max(1, B // 2))
    for bb in range(cap, 0, -1):
        if B % bb == 0:
            return bb
    return 1


def attn_slot(hidden, outputs, mask):
    """hidden (B,S,H), outputs (B,L,H), mask (B,S,L) bool -> context (B,S,H)."""
    B, S, H = hidden.shape
    _, L, _ = outputs.shape

    # Lane-dense H (multiple of 128), sublane-dense S (multiple of 8).
    hidden_p = _pad_axis(_pad_axis(hidden, 2, 128), 1, 8)     # (B, Sp, Hp)
    outputs_p = _pad_axis(outputs, 2, 128)                    # (B, L, Hp)
    mask_i8 = _pad_axis(mask.astype(jnp.int8), 1, 8)          # (B, Sp, L)
    Sp, Hp = hidden_p.shape[1], hidden_p.shape[2]

    bB = _pick_batch_block(B)
    grid = (B // bB,)

    # Per-step VMEM budget (double-buffered in/out + f32 score intermediates).
    itemsize = hidden_p.dtype.itemsize
    per_step = bB * (Sp * Hp * itemsize        # hidden block
                     + L * Hp * itemsize       # outputs block
                     + Sp * L                  # int8 mask block
                     + Sp * Hp * itemsize)     # output block
    vmem_bytes = int(min(64 * 1024 * 1024,
                         max(16 * 1024 * 1024,
                             4 * per_step + 2 * bB * Sp * L * 4)))

    ctx_p = pl.pallas_call(
        attn_slot_kernel,
        out_shape=jax.ShapeDtypeStruct((B, Sp, Hp), outputs.dtype),
        grid=grid,
        in_specs=[
            pl.BlockSpec((bB, Sp, Hp), lambda i: (i, 0, 0)),
            pl.BlockSpec((bB, L, Hp), lambda i: (i, 0, 0)),
            pl.BlockSpec((bB, Sp, L), lambda i: (i, 0, 0)),
        ],
        out_specs=pl.BlockSpec((bB, Sp, Hp), lambda i: (i, 0, 0)),
        compiler_params=pltpu.CompilerParams(
            dimension_semantics=("parallel",),
            vmem_limit_bytes=vmem_bytes,
        ),
    )(hidden_p, outputs_p, mask_i8)

    return ctx_p[:, :S, :H]


def attn_slot_reference(hidden, outputs, mask):
    scores = jnp.einsum("bsh,blh->bsl", hidden, outputs)
    scores = jnp.where(mask, jnp.float32(-1e12), scores)
    alpha = jax.nn.softmax(scores, axis=-1)
    return jnp.einsum("bsl,blh->bsh", alpha, outputs)


if __name__ == "__main__":
    # AttnSlot has no learnable parameters; only inputs are needed.
    B, S, L, H = 2, 8, 16, 32
    key = jax.random.PRNGKey(0)
    k1, k2 = jax.random.split(key)
    hidden = jax.random.normal(k1, (B, S, H), dtype=jnp.float32)
    outputs = jax.random.normal(k2, (B, L, H), dtype=jnp.float32)

    # padding mask: sequence 0 uses all L positions, sequence 1 only first 10
    lengths = jnp.array([L, 10], dtype=jnp.int32)
    mask = jnp.broadcast_to(
        jnp.arange(L)[None, None, :] >= lengths[:, None, None], (B, S, L)
    )

    ctx = attn_slot(hidden, outputs, mask)
    jax.block_until_ready(ctx)

    ref = attn_slot_reference(hidden, outputs, mask)
    assert ctx.shape == (B, S, H)
    # tolerance loosened slightly for the EUP approximate reciprocal
    assert jnp.allclose(ctx, ref, atol=5e-3, rtol=5e-3), "mismatch vs reference"
    print("KERNEL_OK")
</pallas_src>

<mosaic_0001>
module attributes {stable_mosaic.version = 11 : i64} {
  func.func @attn_slot_kernel(%arg0: i32, %arg1: memref<1x8x128xf32, #tpu.memory_space<vmem>>, %arg2: memref<1x16x128xf32, #tpu.memory_space<vmem>>, %arg3: memref<1x8x16xi8, #tpu.memory_space<vmem>>, %arg4: memref<1x8x128xf32, #tpu.memory_space<vmem>>) attributes {dimension_semantics = [#tpu.dimension_semantics<parallel>], iteration_bounds = array<i64: 2>, scalar_prefetch = 0 : i64, scratch_operands = 0 : i64, tpu.core_type = #tpu.core_type<tc>, window_params = [{transform_indices = @transform_0, window_bounds = array<i64: 1, 8, 128>}, {transform_indices = @transform_1, window_bounds = array<i64: 1, 16, 128>}, {transform_indices = @transform_2, window_bounds = array<i64: 1, 8, 16>}, {transform_indices = @transform_3, window_bounds = array<i64: 1, 8, 128>}]} {
    %c0 = arith.constant 0 : index
    %c0_0 = arith.constant 0 : index
    %c0_1 = arith.constant 0 : index
    %0 = vector.load %arg1[%c0, %c0_0, %c0_1] : memref<1x8x128xf32, #tpu.memory_space<vmem>>, vector<1x8x128xf32>
    %c0_2 = arith.constant 0 : index
    %c0_3 = arith.constant 0 : index
    %c0_4 = arith.constant 0 : index
    %1 = vector.load %arg2[%c0_2, %c0_3, %c0_4] : memref<1x16x128xf32, #tpu.memory_space<vmem>>, vector<1x16x128xf32>
    %c0_5 = arith.constant 0 : index
    %c0_6 = arith.constant 0 : index
    %c0_7 = arith.constant 0 : index
    %2 = vector.load %arg3[%c0_5, %c0_6, %c0_7] : memref<1x8x16xi8, #tpu.memory_space<vmem>>, vector<1x8x16xi8>
    %cst = arith.constant dense<0.000000e+00> : vector<1x8x16xf32>
    %3 = tpu.matmul %0, %1, %cst {dimension_numbers = #tpu.dot_dimension_numbers<[2], [2], [1], [1], [0, 0, 0, 1, 1, 1], [0], [0]>} : vector<1x8x128xf32>, vector<1x16x128xf32>, vector<1x8x16xf32> -> vector<1x8x16xf32>
    %c0_i8 = arith.constant 0 : i8
    %4 = vector.broadcast %c0_i8 : i8 to vector<1x8x16xi8>
    %5 = arith.cmpi ne, %2, %4 : vector<1x8x16xi8>
    %cst_8 = arith.constant -9.99999995E+11 : f32
    %6 = vector.broadcast %cst_8 : f32 to vector<1x8x16xf32>
    %7 = arith.select %5, %6, %3 : vector<1x8x16xi1>, vector<1x8x16xf32>
    %cst_9 = arith.constant dense<0xFF800000> : vector<1x8xf32>
    %8 = vector.multi_reduction <maximumf>, %7, %cst_9 [2] : vector<1x8x16xf32> to vector<1x8xf32>
    %9 = vector.shape_cast %8 : vector<1x8xf32> to vector<1x8x1xf32>
    %10 = vector.broadcast %9 : vector<1x8x1xf32> to vector<1x8x16xf32>
    %11 = arith.subf %7, %10 : vector<1x8x16xf32>
    %12 = math.exp %11 : vector<1x8x16xf32>
    %cst_10 = arith.constant dense<0.000000e+00> : vector<1x8xf32>
    %13 = vector.multi_reduction <add>, %12, %cst_10 [2] : vector<1x8x16xf32> to vector<1x8xf32>
    %14 = vector.shape_cast %13 : vector<1x8xf32> to vector<1x8x1xf32>
    %cst_11 = arith.constant dense<0.000000e+00> : vector<1x8x128xf32>
    %15 = tpu.matmul %12, %1, %cst_11 {dimension_numbers = #tpu.dot_dimension_numbers<[2], [1], [1], [2], [0, 0, 0, 1, 1, 2], [0], [0]>} : vector<1x8x16xf32>, vector<1x16x128xf32>, vector<1x8x128xf32> -> vector<1x8x128xf32>
    %16 = tpu.reciprocal %14 {approx = true} : vector<1x8x1xf32> -> vector<1x8x1xf32>
    %17 = vector.broadcast %16 : vector<1x8x1xf32> to vector<1x8x128xf32>
    %18 = arith.mulf %15, %17 : vector<1x8x128xf32>
    %c0_12 = arith.constant 0 : index
    %c0_13 = arith.constant 0 : index
    %c0_14 = arith.constant 0 : index
    %19 = vector.load %arg4[%c0_12, %c0_13, %c0_14] : memref<1x8x128xf32, #tpu.memory_space<vmem>>, vector<1x8x128xf32>
    tpu.vector_store %arg4[%c0_12, %c0_13, %c0_14], %18 {strides = array<i32>} : memref<1x8x128xf32, #tpu.memory_space<vmem>>, vector<1x8x128xf32>,
    return
  }
  func.func @transform_0(%arg0: i32) -> (i32, i32, i32) {
    %c0_i32 = arith.constant 0 : i32
    %c0_i32_0 = arith.constant 0 : i32
    %c0_i32_1 = arith.constant 0 : i32
    return %arg0, %c0_i32, %c0_i32_0 : i32, i32, i32
  }
  func.func @transform_1(%arg0: i32) -> (i32, i32, i32) {
    %c0_i32 = arith.constant 0 : i32
    %c0_i32_0 = arith.constant 0 : i32
    %c0_i32_1 = arith.constant 0 : i32
    return %arg0, %c0_i32, %c0_i32_0 : i32, i32, i32
  }
  func.func @transform_2(%arg0: i32) -> (i32, i32, i32) {
    %c0_i32 = arith.constant 0 : i32
    %c0_i32_0 = arith.constant 0 : i32
    %c0_i32_1 = arith.constant 0 : i32
    return %arg0, %c0_i32, %c0_i32_0 : i32, i32, i32
  }
  func.func @transform_3(%arg0: i32) -> (i32, i32, i32) {
    %c0_i32 = arith.constant 0 : i32
    %c0_i32_0 = arith.constant 0 : i32
    %c0_i32_1 = arith.constant 0 : i32
    return %arg0, %c0_i32, %c0_i32_0 : i32, i32, i32
  }
}

</mosaic_0001>

<bundles_post_ra>
// kernel: tpu_custom_call.1
= control target key start
LH: loop header
LB: loop body
LE: loop exit
PB: predicated region body
PF: predicated region fallthrough
CT: control target
= control target key end

     0   :  { %8 = vsyncpa [#allocation3], 0  ;;  %s1017_s0 = inlined_call_operand.hbm [shape: f32[2,8,128], index: 0, kind: input, shape index: {}]   ;;  %s1018_s1 = inlined_call_operand.hbm [shape: f32[2,16,128], index: 1, kind: input, shape index: {}]   ;;  %s1019_s2 = inlined_call_operand.vmem [shape: s8[2,8,16], index: 2, kind: input, shape index: {}]   ;;  %s1020_s3 = inlined_call_operand.hbm [shape: f32[2,8,128], index: 3, kind: output, shape index: {}]  }
   0x1   :  { %10 = vsyncpa [#allocation3 + $0x1], 0 }
   0x2   :  { %11 = vsyncpa [#allocation6], 0 }
   0x3   :  { %13 = vsyncpa [#allocation6 + $0x1], 0 }
   0x4   :  { %14 = vsyncpa [#allocation4], 0 }
   0x5   :  { %16 = vsyncpa [#allocation4 + $0x1], 0  ;;  %s796_s12 = smov 0   ;;  %s798_s13 = smov 0  }
   0x6   :  { %s800_s14 = smov 0   ;;  %s802_s15 = smov 0  }
   0x7 LB: > { %s817_s16 = sadd.s32 4294967295, %s765_s15   ;;  %s529_s17 = sadd.s32 4294967294, %s765_s15   ;;  %s765_s15 = sphi %s802_s15, %s1038_s15   ;;  %s761_s14 = sphi %s800_s14, %s1037_s14   ;;  %s757_s13 = sphi %s798_s13, %s1036_s13   ;;  %s753_s12 = sphi %s796_s12, %s1035_s12  }
   0x8   : > { %s821_s18 = sadd.s32 1, %s765_s15   ;;  %s29_s19 = sadd.s32 1, %s761_s14 }
   0x9   : > { %s26_s20 = ssub.s32 %s765_s15, %s821_s18  ;;  %p36_p0 = scmp.ne.s32.totalorder %s761_s14, %s757_s13 }
   0xa   : > { %p27_p1 = scmp.eq.s32.totalorder %s26_s20, 0  ;;  %p37_p2 = scmp.eq.s32.totalorder %s765_s15, 0 }
   0xb   : > { %p42_p3 = scmp.ne.s32.totalorder %s757_s13, %s753_s12  ;;  %p43_p4 = scmp.eq.s32.totalorder %s817_s16, 0 }
   0xc   : > { %s833_s21 = scalar_select %p27_p1, %s761_s14, %s29_s19  }
   0xd   : > { %p835_p5 = por %p37_p2, %p36_p0  ;;  %p839_p6 = por %p43_p4, %p42_p3 }
   0xe   : > { %p118_p7 = scmp.eq.s32.totalorder %s817_s16, 1  ;;  %p124_p8 = scmp.eq.s32.totalorder %s529_s17, 1 }
   0xf   : > { %s1024_s23 = scalar_select %p839_p6, 1, 0 }
  0x10   : > { %p591_p10 = scmp.lt.s32.totalorder %s765_s15, 2  ;;  %p846_p11 = por %p118_p7, %p36_p0 }
  0x11   : > { %p850_p12 = por %p124_p8, %p42_p3  ;;  %s855_s26 = sand.u32 1, %s761_s14  }
  0x12   : > { %s1025_s24 = scalar_select %p846_p11, 1, 0 }
  0x13   : > { %s1026_s25 = scalar_select %p850_p12, 1, 0 }
  0x14   : > { %s533_s27 = sshll.u32 %s765_s15, 7  ;;  %s532_s28 = sshll.u32 %s855_s26, 3 }
  0x15   : > { %s862_s4 = scalar_lea.hbm %s1017_s0, %s533_s27  ;;  %s148_s5 = scalar_lea.vmem [#allocation2], %s532_s28 }
  0x16   : > { %s155_s6 = sshll.u32 %s148_s5, 4  ;;  %p866_p13 = pnand %p591_p10, %p835_p5  ;;  %s870_s6 = int_to_ptr.vmem [resolvable:$true] %s155_s6 }
  0x17   : > { %s145_s8 = scalar_lea.sflag [#allocation3], %s855_s26  ;;  %s635_s9 = scalar_lea.hbm %s862_s4, 128 }
  0x18   : > { %p636_p2 = scmp.ne.s32.totalorder %s862_s4, %s635_s9  ;;  %p637_p3 = pneg %p866_p13 }
  0x19   : > { %s640_s17 = scalar_lea.hbm %s1017_s0, 256  ;;  %p641_p5 = scmp.lt.u32.totalorder %s862_s4, %s1017_s0 }
  0x1a   : > { %p638_p4 = pnand %p637_p3, %p636_p2  ;;  %p642_p8 = scmp.lt.u32.totalorder %s640_s17, %s635_s9 }
  0x1b   : > { %p644_p9 = scmp.lt.u32.totalorder %s635_s9, %s862_s4 }
  0x1c   : > { %p639_p7 = pneg %p638_p4  ;;  %p643_p10 = por %p642_p8, %p641_p5 }
  0x1e   : > { %p645_p0 = por %p644_p9, %p643_p10 }
  0x20   : > { %p646_p1 = pnand %p645_p0, %p639_p7 }
  0x22   : > { %649 = shalt.err (!%p646_p1)
}
  0x23   : > { %s650_s22 = scalar_lea.vmem %s870_s6, 128  ;;  %s767_s27 = smov [#allocation2]  }
  0x24   : > { %p651_p2 = scmp.ne.s32.totalorder %s870_s6, %s650_s22  ;;  %s655_s28 = sshll.u32 %s767_s27, 4  ;;  %s656_s28 = int_to_ptr.vmem [resolvable:$false] %s655_s28 }
  0x25   : > { %s657_s29 = scalar_lea.vmem %s656_s28, 256  ;;  %p658_p11 = scmp.lt.s32.totalorder %s870_s6, %s656_s28 }
  0x26   : > { %p653_p4 = pnand %p651_p2, %p637_p3  ;;  %p659_p5 = scmp.lt.s32.totalorder %s657_s29, %s650_s22 }
  0x28   : > { %p654_p12 = pneg %p653_p4  ;;  %p660_p8 = por %p659_p5, %p658_p11 }
  0x2a   : > { %p661_p9 = pnand %p660_p8, %p654_p12 }
  0x2c   : > { %664 = shalt.err (!%p661_p9)
}
  0x2d   : > { %583 = dma.hbm_to_vmem [thread:$0]  (!%p866_p13), %s862_s4, 128, %s870_s6, %s145_s8  }
  0x2e   : > { %p1028_p0 = scmp.lt.s32.totalorder %s765_s15, 3  ;;  %p1029_p1 = scmp.ge.s32.totalorder %s765_s15, 1 }
  0x2f   : > { %s534_s5 = sshll.u32 %s855_s26, 4  ;;  %s547_s9 = sshll.u32 %s765_s15, 8 }
  0x30   : > { %p904_p7 = pnand %p1029_p1, %p1028_p0  ;;  %s913_s17 = scalar_lea.hbm %s1018_s1, %s547_s9 }
  0x31   : > { %s166_s19 = scalar_lea.vmem [#allocation5], %s534_s5  ;;  %s163_s4 = scalar_lea.sflag [#allocation6], %s855_s26 }
  0x32   : > { %s173_s20 = sshll.u32 %s166_s19, 4  ;;  %s665_s6 = scalar_lea.hbm %s913_s17, 256  ;;  %s915_s20 = int_to_ptr.vmem [resolvable:$true] %s173_s20 }
  0x33   : > { %p666_p11 = scmp.ne.s32.totalorder %s913_s17, %s665_s6  ;;  %s670_s27 = scalar_lea.hbm %s1018_s1, 512 }
  0x34   : > { %p671_p2 = scmp.lt.u32.totalorder %s913_s17, %s1018_s1  ;;  %p672_p4 = scmp.lt.u32.totalorder %s670_s27, %s665_s6 }
  0x35   : > { %p668_p12 = pnand %p666_p11, %p637_p3  ;;  %p674_p8 = scmp.lt.u32.totalorder %s665_s6, %s913_s17 }
  0x36   : > { %p673_p5 = por %p672_p4, %p671_p2 }
  0x37   : > { %p669_p10 = pneg %p668_p12 }
  0x38   : > { %p675_p9 = por %p674_p8, %p673_p5 }
  0x3a   : > { %p676_p0 = pnand %p675_p9, %p669_p10 }
  0x3c   : > { %679 = shalt.err (!%p676_p0)
}
  0x3d   : > { %s680_s5 = scalar_lea.vmem %s915_s20, 256  ;;  %s768_s9 = smov [#allocation5]  }
  0x3e   : > { %p681_p1 = scmp.ne.s32.totalorder %s915_s20, %s680_s5  ;;  %s685_s10 = sshll.u32 %s768_s9, 4  ;;  %s686_s10 = int_to_ptr.vmem [resolvable:$false] %s685_s10 }
  0x3f   : > { %s687_s11 = scalar_lea.vmem %s686_s10, 512  ;;  %p688_p6 = scmp.lt.s32.totalorder %s915_s20, %s686_s10 }
  0x40   : > { %p683_p11 = pnand %p681_p1, %p637_p3  ;;  %p689_p2 = scmp.lt.s32.totalorder %s687_s11, %s680_s5 }
  0x42   : > { %p684_p12 = pneg %p683_p11  ;;  %p690_p4 = por %p689_p2, %p688_p6 }
  0x44   : > { %p691_p5 = pnand %p690_p4, %p684_p12 }
  0x46   : > { %694 = shalt.err (!%p691_p5)
}
  0x47   : > { %s769_s19 = smov 128   ;;  %s770_s6 = smov 8  }
  0x48   : > { %586 = dma.hbm_to_vmem [thread:$0]  (!%p866_p13), %s913_s17, 256, %s915_s20, %s163_s4, %s769_s19, %s769_s19, %s770_s6  }
  0x49   : > { %192 = sbr.rel (%p904_p7) target bundleno = 693 (0x2b5), region = 32  ;;  %s946_s8 = sand.u32 (!%p904_p7), 1, %s757_s13  }
  0x4a   : > { %s538_s22 = sshll.u32 (!%p904_p7), %s946_s8, 3  ;;  %s195_s27 = scalar_lea.sflag (!%p904_p7), [#allocation3], %s946_s8 }
  0x4b   : > { %s198_s28 = scalar_lea.vmem (!%p904_p7), [#allocation2], %s538_s22  ;;  %p1031_p6 = scmp.ne.s32.totalorder (!%p904_p7), %s1024_s23, 0 }
  0x50   : > { %740 = dma.done.wait (%p1031_p6), %s195_s27, 128  }
  0x51   : > { %742 = vsyncadd (%p1031_p6), %s195_s27, 4294967168  ;;  %s539_s26 = sshll.u32 %s946_s8, 4  ;;  %s204_s7 = scalar_lea.sflag [#allocation6], %s946_s8 }
  0x52   : > { %s207_s30 = scalar_lea.vmem [#allocation5], %s539_s26 }
  0x53   : > { %744 = dma.done.wait (%p1031_p6), %s204_s7, 256  }
  0x54   : > { %746 = vsyncadd (%p1031_p6), %s204_s7, 4294967040  ;;  %v771_v0 = vmov 0.0|0.0   ;;  %vm772_vm0 = vmmov 0   ;;  %v773_v1 = vmov 0.0   ;;  %v246_v2 = vld [vmem:[%s207_s30] sm:$0xff]  ;;  %v247_v3 = vld [vmem:[%s207_s30 + $0x8] sm:$0xff] }
  0x55   : > { %568 = vmatprep.subr.bf16.mxu0 %v771_v0  ;;  %558 = vmatprep.mubr.msk.f32.mxu0 %vm772_vm0, %v773_v1  ;;  %v569_v4 = vpack.c.bf16 %v247_v3, %v246_v2  ;;  %v245_v5 = vld [vmem:[%s198_s28] sm:$0xff]  ;;  %p239_p13 = scmp.lt.s32.totalorder %s817_s16, 1  ;;  %v774_v7 = vmov 0   ;;  %vm324_vm3 = vcmask 130048   ;;  %s544_s5 = sshll.u32 %s817_s16, 7 }
  0x56   : > { %571 = vmatprep.subr.bf16.mxu1 %v771_v0  ;;  %565 = vmatprep.mubr.msk.f32.mxu1 %vm772_vm0, %v773_v1  ;;  %s238_s9 = scalar_lea.vmem [#allocation7], %s538_s22  ;;  %s973_s6 = scalar_lea.hbm %s1020_s3, %s544_s5 }
  0x57   : > { %570 = vmatpush3.bf16.xpose.msra.mxu0 %v569_v4  ;;  %573 = vmatpush3.bf16.msra.mxu1 %v569_v4  ;;  %s240_s17 = scalar_select %p239_p13, %s817_s16, 1 }
  0x58   : > { %s424_s10 = sshll.u32 %s238_s9, 4  ;;  %s411_s27 = scalar_lea.sflag [#allocation4], %s946_s8  ;;  %s975_s10 = int_to_ptr.vmem [resolvable:$true] %s424_s10 }
  0x59   : > { %s541_s23 = sshll.u32 %s240_s17, 1  ;;  %s695_s16 = scalar_lea.vmem %s975_s10, 128 }
  0x5a   : > { %s242_s29 = scalar_lea.vmem %s1019_s2, %s541_s23  ;;  %p696_p3 = scmp.ne.s32.totalorder %s975_s10, %s695_s16 }
  0x5b   : > { %v248_v6 = vld [vmem:[%s242_s29] sm:$0x3]  ;;  %p1032_p7 = scmp.ne.s32.totalorder %s1025_s24, 0  ;;  %s775_s22 = smov [#allocation7]  }
  0x5c   : > { %vm319_vm1 = vnez %v248_v6  ;;  %s699_s28 = sshll.u32 %s775_s22, 4  ;;  %s700_s28 = int_to_ptr.vmem [resolvable:$false] %s699_s28 }
  0x5d   : > { %v320_v8 = vsel %vm319_vm1, 16843009, %v774_v7  ;;  %p697_p10 = pnand %p696_p3, %p1032_p7  ;;  %s701_s26 = scalar_lea.vmem %s700_s28, 256 }
  0x5e   : > { %559 = vmatmul.mubr.f32.vlgmr.msra.gmra.mrb[0].mxu0 %v245_v5  ;;  %v321_v9 = vunpack.c.0.s8 %v320_v8  ;;  %p702_p9 = scmp.lt.s32.totalorder %s975_s10, %s700_s28  ;;  %p703_p0 = scmp.lt.s32.totalorder %s701_s26, %s695_s16 }
  0x5f   : > { %p698_p8 = pneg %p697_p10 }
  0x60   : > { %vm322_vm2 = vcmp.ne.s32.totalorder %v321_v9, 0  ;;  %p704_p1 = por %p703_p0, %p702_p9 }
  0x62   : > { %p705_p11 = pnand %p704_p1, %p698_p8 }
 0x131   : > { %v315_v10 = vpop.f32.mrb[0].mxu0 }
 0x132   : > { %v323_v11 = vsel %vm322_vm2, -1e+12, %v315_v10  ;;  %v560_v12 = vpop.f32.mrb[1].mxu0 }
 0x133   : > { %v325_v13 = vsel %vm324_vm3, %v323_v11, -inf }
 0x134   : > { %326 = vmax.xlane.f32.xlu0 %v325_v13 }
 0x1c1   : > { %v327_v14 = vpop.xlane.xlu0 %326 }
 0x1c2   : > { %v328_v15 = vsub.f32 %v323_v11, %v327_v14 }
 0x1c4   : > { %v329_v16 = vmul.f32 1.442695, %v328_v15 }
 0x1c6   : > { %631 = vpow2.f32 %v329_v16 }
 0x1d0   : > { %v632_v17 = vpop.eup %631 }
 0x1d1   : > { %566 = vmatmul.mubr.msk.f32.vlgmr.msra.gmra.mrb[0].mxu1 %vm324_vm3, %v632_v17  ;;  %v331_v18 = vsel %vm324_vm3, %v632_v17, 0.0 }
 0x1d2   : > { %332 = vadd.xlane.f32.xlu0 %v331_v18 }
 0x25f   : > { %v333_v19 = vpop.xlane.xlu0 %332 }
 0x260   : > { %633 = vrcp.f32 %v333_v19 }
 0x26a   : > { %v634_v20 = vpop.eup %633 }
 0x2a4   : > { %v403_v21 = vpop.f32.mrb[0].mxu1 }
 0x2a5   : > { %v408_v22 = vmul.f32 %v634_v20, %v403_v21  ;;  %v567_v23 = vpop.f32.mrb[1].mxu1 }
 0x2a7   : > { %409 = vst [vmem:[%s238_s9] sm:$0xff] %v408_v22 }
 0x2a8   : > { %708 = shalt.err (!%p705_p11)
}
 0x2a9   : > { %s709_s8 = scalar_lea.hbm %s973_s6, 128  ;;  %s713_s17 = scalar_lea.hbm %s1020_s3, 256 }
 0x2aa   : > { %p710_p12 = scmp.ne.s32.totalorder %s973_s6, %s709_s8  ;;  %p714_p5 = scmp.lt.u32.totalorder %s973_s6, %s1020_s3 }
 0x2ab   : > { %p715_p6 = scmp.lt.u32.totalorder %s713_s17, %s709_s8  ;;  %p717_p3 = scmp.lt.u32.totalorder %s709_s8, %s973_s6 }
 0x2ac   : > { %p711_p2 = pnand %p710_p12, %p1032_p7 }
 0x2ad   : > { %p716_p13 = por %p715_p6, %p714_p5 }
 0x2ae   : > { %p712_p4 = pneg %p711_p2 }
 0x2af   : > { %p718_p10 = por %p717_p3, %p716_p13 }
 0x2b1   : > { %p719_p8 = pnand %p718_p10, %p712_p4 }
 0x2b3   : > { %722 = shalt.err (!%p719_p8)
}
 0x2b4   : > { %578 = dma.vmem_to_hbm [thread:$0]  (%p1032_p7), %s975_s10, 128, %s973_s6, %s411_s27  }
 0x2b5 PF: > { %s436_s4 = sand.u32 1, %s753_s12   ;;  %p1033_p9 = scmp.ne.s32.totalorder %s1026_s25, 0 }
 0x2b6   : > { %p1034_p0 = scmp.ge.s32.totalorder %s765_s15, 2  ;;  %s437_s29 = scalar_lea.sflag [#allocation4], %s436_s4 }
 0x2b8   : > { %p588_p1 = pnand %p1034_p0, %p1033_p9 }
 0x2ba   : > { %748 = dma.done.wait (!%p588_p1), %s437_s29, 128  }
 0x2bb   : > { %750 = vsyncadd (!%p588_p1), %s437_s29, 4294967168  ;;  %p19_p11 = scmp.ge.s32.totalorder %s821_s18, 4   ;;  %s1035_s12 = smov %s757_s13 }
 0x2bc   : > { %s1036_s13 = smov %s761_s14  ;;  %s1037_s14 = smov %s833_s21 }
 0x2bd   : > { %s1038_s15 = smov %s821_s18  ;;  %21 = sbr.rel (!%p19_p11) target bundleno = 7 (0x7), region = 93 }
 0x2c4   :  { %442 = vsyncpa [#allocation3], 1 }
 0x2c5   :  { %444 = vsyncpa [#allocation3 + $0x1], 1 }
 0x2c6   :  { %445 = vsyncpa [#allocation6], 1 }
 0x2c7   :  { %447 = vsyncpa [#allocation6 + $0x1], 1 }
 0x2c8   :  { %448 = vsyncpa [#allocation4], 1 }
 0x2c9   :  { %450 = vsyncpa [#allocation4 + $0x1], 1 }

</bundles_post_ra>
